<compile_context>
chip_gen: v7x
topology: tpu7x:2x2x1
jax: 0.10.0
libtpu: 0.0.40
codegen_flags: <defaults>
</compile_context>

<pallas_src>
import functools

import jax
import jax.numpy as jnp
from jax.experimental import pallas as pl
from jax.experimental.pallas import tpu as pltpu


def t2v_kernel(tau_ref, w_aug_ref, b_aug_ref, wfc_ref, bfc_ref, out_ref, *,
               periodic_fn, hidden):
    # tau_ref:   (1, TILE_N)
    # w_aug_ref: (H, 1)   — concat([w, w0]).T
    # b_aug_ref: (H, 1)   — concat([b, b0]).T
    # wfc_ref:   (E, H)   — nn.Linear weight
    # bfc_ref:   (E, 1)
    # out_ref:   (TILE_N, E)
    tau = tau_ref[...]                                         # (1, TILE_N)

    # pre[h, n] = tau[n] * w_aug[h] + b_aug[h]  (outer product, VPU broadcast)
    pre = w_aug_ref[...] * tau + b_aug_ref[...]                # (H, TILE_N)

    # Periodic activation on ALL rows (no per-element mask); the last row is
    # fixed up after the matmul via a rank-1 correction.
    h = periodic_fn(pre)                                       # (H, TILE_N)

    # fc: out^T = Wfc @ h + bfc   (single aligned K=H matmul on the MXU)
    out_t = jnp.dot(wfc_ref[...], h,
                    preferred_element_type=jnp.float32)        # (E, TILE_N)

    # Rank-1 correction: the reference leaves the last hidden feature linear
    # (v2 = tau*w0 + b0, no activation).  Replace Wfc[:,H-1]*f(pre[H-1]) with
    # Wfc[:,H-1]*pre[H-1] by adding Wfc[:,H-1] ⊗ (pre[H-1] - f(pre[H-1])).
    delta = pre[hidden - 1:hidden, :] - h[hidden - 1:hidden, :]    # (1, TILE_N)
    out_t = out_t + bfc_ref[...] + wfc_ref[:, hidden - 1:hidden] * delta

    # In-kernel transpose (XLU) -> (TILE_N, E); written straight to (N, E)
    # output layout, so the wrapper needs no transpose at all.
    out_ref[...] = jnp.transpose(out_t).astype(out_ref.dtype)


def t2v_forward(tau, w, b, w0, b0, wfc, bfc, *, activation="sin",
                tile_n=None, out_dtype=jnp.float32):
    """Time2Vec forward.

    tau: (N, 1).  wfc: (E, H) in PyTorch nn.Linear convention.
    Returns (N, E) in `out_dtype` (float32 by default; bf16 halves the
    dominant HBM write on v5e if the consumer tolerates it).
    """
    n = tau.shape[0]
    emb, hidden = wfc.shape

    if activation == "sin":
        periodic_fn = jnp.sin
    elif activation == "cos":
        periodic_fn = jnp.cos
    else:
        raise ValueError(f"'{activation}' is not supported")

    # --- parameter prep (hoisted by XLA under jit) ---
    w_aug_t = jnp.concatenate([w, w0], axis=1).T.astype(jnp.float32)  # (H, 1)
    b_aug_t = jnp.concatenate([b, b0], axis=1).T.astype(jnp.float32)  # (H, 1)
    bfc_col = bfc.reshape(emb, 1).astype(jnp.float32)                 # (E, 1)
    wfc = wfc.astype(jnp.float32)                                     # (E, H)

    # --- lane-dense input layout: N on the 128-lane axis, padded to tiles ---
    if tile_n is None:
        # ~6-7 MiB live per step at 16K columns: fits the 32 MiB default
        # scoped VMEM on v5e/v6e/v7x and keeps >=2 grid steps on v7x so the
        # "parallel" axis shards across both TensorCores.  Sweep per gen.
        tile_n = min(16384, pl.cdiv(n, 128) * 128)
    n_pad = pl.cdiv(n, tile_n) * tile_n
    tau_t = tau.reshape(1, n).astype(jnp.float32)
    if n_pad != n:
        tau_t = jnp.pad(tau_t, ((0, 0), (0, n_pad - n)))

    grid = (n_pad // tile_n,)

    # Resident weight blocks: same (0, 0) block index every grid step.
    resident = lambda shape: pl.BlockSpec(shape, lambda i: (0, 0))

    out_bytes = jnp.dtype(out_dtype).itemsize
    cost = pl.CostEstimate(
        flops=2 * emb * hidden * n_pad + 6 * hidden * n_pad,
        transcendentals=hidden * n_pad,
        bytes_accessed=(n_pad * 4                      # tau read
                        + n_pad * emb * out_bytes      # output write
                        + (2 * hidden + emb * hidden + emb) * 4),
    )

    out = pl.pallas_call(
        functools.partial(t2v_kernel, periodic_fn=periodic_fn, hidden=hidden),
        out_shape=jax.ShapeDtypeStruct((n_pad, emb), out_dtype),
        grid=grid,
        in_specs=[
            pl.BlockSpec((1, tile_n), lambda i: (0, i)),      # tau^T tiles
            resident((hidden, 1)),                            # w_aug^T
            resident((hidden, 1)),                            # b_aug^T
            resident((emb, hidden)),                          # Wfc
            resident((emb, 1)),                               # bfc
        ],
        out_specs=pl.BlockSpec((tile_n, emb), lambda i: (i, 0)),
        compiler_params=pltpu.CompilerParams(
            dimension_semantics=("parallel",)),
        cost_estimate=cost,
    )(tau_t, w_aug_t, b_aug_t, wfc, bfc_col)

    # Only a (cheap) row slice when N isn't tile-aligned; no transpose ever.
    return out if n_pad == n else out[:n]


def t2v_reference(tau, w, b, w0, b0, wfc, bfc, activation="sin"):
    f = jnp.sin if activation == "sin" else jnp.cos
    v1 = f(tau @ w + b)
    v2 = tau @ w0 + b0
    h = jnp.concatenate([v1, v2], axis=1)
    return h @ wfc.T + bfc


if __name__ == "__main__":
    HIDDEN = 32         # hidden_dim
    EMB = 16            # embedding_size

    key = jax.random.PRNGKey(0)
    k_tau, k_w, k_b, k_w0, k_b0, k_wfc, k_bfc = jax.random.split(key, 7)

    # Parameters (torch.randn-style init, deterministic here).
    w = jax.random.normal(k_w, (1, HIDDEN - 1), dtype=jnp.float32)
    b = jax.random.normal(k_b, (1, HIDDEN - 1), dtype=jnp.float32)
    w0 = jax.random.normal(k_w0, (1, 1), dtype=jnp.float32)
    b0 = jax.random.normal(k_b0, (1, 1), dtype=jnp.float32)
    # nn.Linear(hidden, emb): weight (E, H), bias (E,)
    wfc = jax.random.normal(k_wfc, (EMB, HIDDEN), dtype=jnp.float32) * 0.1
    bfc = jax.random.normal(k_bfc, (EMB,), dtype=jnp.float32) * 0.1

    ok = True

    # Small single-tile case (N = 8 time indices).
    N = 8
    tau = jax.random.normal(k_tau, (N, 1), dtype=jnp.float32)
    for act in ("sin", "cos"):
        out = jax.block_until_ready(
            t2v_forward(tau, w, b, w0, b0, wfc, bfc, activation=act))
        ref = t2v_reference(tau, w, b, w0, b0, wfc, bfc, activation=act)
        assert out.shape == (N, EMB)
        ok = ok and bool(jnp.allclose(out, ref, atol=1e-5, rtol=1e-5))

    # Multi-tile + unaligned-tail case (exercises the grid / padding path).
    N2 = 300
    tau2 = jax.random.normal(k_tau, (N2, 1), dtype=jnp.float32)
    out2 = jax.block_until_ready(
        t2v_forward(tau2, w, b, w0, b0, wfc, bfc, activation="sin",
                    tile_n=128))
    ref2 = t2v_reference(tau2, w, b, w0, b0, wfc, bfc, activation="sin")
    assert out2.shape == (N2, EMB)
    ok = ok and bool(jnp.allclose(out2, ref2, atol=1e-5, rtol=1e-5))

    if ok:
        print("KERNEL_OK")
</pallas_src>

<mosaic_0001>
module attributes {stable_mosaic.version = 11 : i64} {
  func.func @t2v_kernel(%arg0: i32, %arg1: memref<1x128xf32, #tpu.memory_space<vmem>>, %arg2: memref<32x1xf32, #tpu.memory_space<vmem>>, %arg3: memref<32x1xf32, #tpu.memory_space<vmem>>, %arg4: memref<16x32xf32, #tpu.memory_space<vmem>>, %arg5: memref<16x1xf32, #tpu.memory_space<vmem>>, %arg6: memref<128x16xf32, #tpu.memory_space<vmem>>) attributes {dimension_semantics = [#tpu.dimension_semantics<parallel>], iteration_bounds = array<i64: 1>, scalar_prefetch = 0 : i64, scratch_operands = 0 : i64, tpu.core_type = #tpu.core_type<tc>, window_params = [{transform_indices = @transform_0, window_bounds = array<i64: 1, 128>}, {pipeline_mode = #tpu.pipeline_mode<synchronous>, transform_indices = @transform_1, window_bounds = array<i64: 32, 1>}, {pipeline_mode = #tpu.pipeline_mode<synchronous>, transform_indices = @transform_2, window_bounds = array<i64: 32, 1>}, {pipeline_mode = #tpu.pipeline_mode<synchronous>, transform_indices = @transform_3, window_bounds = array<i64: 16, 32>}, {pipeline_mode = #tpu.pipeline_mode<synchronous>, transform_indices = @transform_4, window_bounds = array<i64: 16, 1>}, {transform_indices = @transform_5, window_bounds = array<i64: 128, 16>}]} {
    %c0 = arith.constant 0 : index
    %c0_0 = arith.constant 0 : index
    %0 = vector.load %arg1[%c0, %c0_0] : memref<1x128xf32, #tpu.memory_space<vmem>>, vector<1x128xf32>
    %c0_1 = arith.constant 0 : index
    %c0_2 = arith.constant 0 : index
    %1 = vector.load %arg2[%c0_1, %c0_2] : memref<32x1xf32, #tpu.memory_space<vmem>>, vector<32x1xf32>
    %2 = vector.broadcast %1 : vector<32x1xf32> to vector<32x128xf32>
    %3 = vector.broadcast %0 : vector<1x128xf32> to vector<32x128xf32>
    %4 = arith.mulf %2, %3 : vector<32x128xf32>
    %c0_3 = arith.constant 0 : index
    %c0_4 = arith.constant 0 : index
    %5 = vector.load %arg3[%c0_3, %c0_4] : memref<32x1xf32, #tpu.memory_space<vmem>>, vector<32x1xf32>
    %6 = vector.broadcast %5 : vector<32x1xf32> to vector<32x128xf32>
    %7 = arith.addf %4, %6 : vector<32x128xf32>
    %8 = math.sin %7 : vector<32x128xf32>
    %c0_5 = arith.constant 0 : index
    %c0_6 = arith.constant 0 : index
    %9 = vector.load %arg4[%c0_5, %c0_6] : memref<16x32xf32, #tpu.memory_space<vmem>>, vector<16x32xf32>
    %cst = arith.constant dense<0.000000e+00> : vector<16x128xf32>
    %10 = tpu.matmul %9, %8, %cst {dimension_numbers = #tpu.dot_dimension_numbers<[1], [0], [0], [1], [0, 0, 1, 1], [], []>} : vector<16x32xf32>, vector<32x128xf32>, vector<16x128xf32> -> vector<16x128xf32>
    %11 = vector.extract_strided_slice %7 {offsets = [31, 0], sizes = [1, 128], strides = [1, 1]} : vector<32x128xf32> to vector<1x128xf32>
    %12 = vector.extract_strided_slice %8 {offsets = [31, 0], sizes = [1, 128], strides = [1, 1]} : vector<32x128xf32> to vector<1x128xf32>
    %13 = arith.subf %11, %12 : vector<1x128xf32>
    %c0_7 = arith.constant 0 : index
    %c0_8 = arith.constant 0 : index
    %14 = vector.load %arg5[%c0_7, %c0_8] : memref<16x1xf32, #tpu.memory_space<vmem>>, vector<16x1xf32>
    %15 = vector.broadcast %14 : vector<16x1xf32> to vector<16x128xf32>
    %16 = arith.addf %10, %15 : vector<16x128xf32>
    %c0_9 = arith.constant 0 : index
    %c31 = arith.constant 31 : index
    %17 = vector.load %arg4[%c0_9, %c31] : memref<16x32xf32, #tpu.memory_space<vmem>>, vector<16x1xf32>
    %18 = vector.broadcast %17 : vector<16x1xf32> to vector<16x128xf32>
    %19 = vector.broadcast %13 : vector<1x128xf32> to vector<16x128xf32>
    %20 = arith.mulf %18, %19 : vector<16x128xf32>
    %21 = arith.addf %16, %20 : vector<16x128xf32>
    %22 = tpu.transpose %21, [1, 0] : vector<16x128xf32> -> vector<128x16xf32>
    %c0_10 = arith.constant 0 : index
    %c0_11 = arith.constant 0 : index
    %23 = vector.load %arg6[%c0_10, %c0_11] : memref<128x16xf32, #tpu.memory_space<vmem>>, vector<128x16xf32>
    tpu.vector_store %arg6[%c0_10, %c0_11], %22 {strides = array<i32>} : memref<128x16xf32, #tpu.memory_space<vmem>>, vector<128x16xf32>,
    return
  }
  func.func @transform_0(%arg0: i32) -> (i32, i32) {
    %c0_i32 = arith.constant 0 : i32
    %c0_i32_0 = arith.constant 0 : i32
    return %c0_i32, %arg0 : i32, i32
  }
  func.func @transform_1(%arg0: i32) -> (i32, i32) {
    %c0_i32 = arith.constant 0 : i32
    %c0_i32_0 = arith.constant 0 : i32
    %c0_i32_1 = arith.constant 0 : i32
    return %c0_i32, %c0_i32_0 : i32, i32
  }
  func.func @transform_2(%arg0: i32) -> (i32, i32) {
    %c0_i32 = arith.constant 0 : i32
    %c0_i32_0 = arith.constant 0 : i32
    %c0_i32_1 = arith.constant 0 : i32
    return %c0_i32, %c0_i32_0 : i32, i32
  }
  func.func @transform_3(%arg0: i32) -> (i32, i32) {
    %c0_i32 = arith.constant 0 : i32
    %c0_i32_0 = arith.constant 0 : i32
    %c0_i32_1 = arith.constant 0 : i32
    return %c0_i32, %c0_i32_0 : i32, i32
  }
  func.func @transform_4(%arg0: i32) -> (i32, i32) {
    %c0_i32 = arith.constant 0 : i32
    %c0_i32_0 = arith.constant 0 : i32
    %c0_i32_1 = arith.constant 0 : i32
    return %c0_i32, %c0_i32_0 : i32, i32
  }
  func.func @transform_5(%arg0: i32) -> (i32, i32) {
    %c0_i32 = arith.constant 0 : i32
    %c0_i32_0 = arith.constant 0 : i32
    return %arg0, %c0_i32 : i32, i32
  }
}

</mosaic_0001>

<bundles_post_ra>
// kernel: tpu_custom_call.1
= control target key start
LH: loop header
LB: loop body
LE: loop exit
PB: predicated region body
PF: predicated region fallthrough
CT: control target
= control target key end

     0   :  { %v754_v0 = vmov 0   ;;  %v755_v11 = vmov 31   ;;  %v756_v54 = vmov 920167782   ;;  %v757_v56 = vmov 1326507024   ;;  %s1291_s2 = inlined_call_operand.vmem [shape: f32[32,1], index: 2, kind: input, shape index: {}]   ;;  %s1292_s1 = inlined_call_operand.vmem [shape: f32[32,1], index: 1, kind: input, shape index: {}]   ;;  %s1293_s4 = inlined_call_operand.vmem [shape: f32[16,1], index: 4, kind: input, shape index: {}]   ;;  %s1294_s3 = inlined_call_operand.vmem [shape: f32[16,32], index: 3, kind: input, shape index: {}]   ;;  %s1295_s0 = inlined_call_operand.vmem [shape: f32[1,128], index: 0, kind: input, shape index: {}]   ;;  %s1296_s5 = inlined_call_operand.vmem [shape: f32[128,16], index: 5, kind: output, shape index: {}]  }
   0x1   :  { %735 = vset.pattern.permute.xlu1 %v754_v0  ;;  %734 = vset.pattern.permute.xlu0 %v754_v0  ;;  %v55_v1 = vld [vmem:[%s1291_s2] sm:$0xff]  ;;  %v56_v3 = vld [vmem:[%s1291_s2 + $0x8] sm:$0xff]  ;;  %v24_v5 = vld [vmem:[%s1292_s1 + $0x18] sm:$0xff]  ;;  %v758_v60 = vmov 2102212464  }
   0x2   :  { %v21_v2 = vld [vmem:[%s1292_s1] sm:$0xff]  ;;  %61 = vperm.xlu1 %735, %v55_v1   ;;  %v22_v4 = vld [vmem:[%s1292_s1 + $0x8] sm:$0xff]  ;;  %v23_v6 = vld [vmem:[%s1292_s1 + $0x10] sm:$0xff] }
   0x3   :  { %27 = vperm.xlu0 %734, %v21_v2   ;;  %v58_v7 = vld [vmem:[%s1291_s2 + $0x18] sm:$0xff]  ;;  %v57_v8 = vld [vmem:[%s1291_s2 + $0x10] sm:$0xff]  ;;  %v502_v9 = vld [vmem:[%s1293_s4] sm:$0xff] }
   0x4   :  { %v822_v10 = vld [vmem:[%s1294_s3] sm:$0xff]  ;;  %v503_v12 = vld [vmem:[%s1293_s4 + $0x8] sm:$0xff] }
   0x5   :  { %v832_v13 = vld [vmem:[%s1294_s3 + $0x8] sm:$0xff]  ;;  %v665_v14 = vld [vmem:[%s1295_s0] ss:$0 sm:$0xff] }
   0x6   :  { %66 = vperm.xlu1 %735, %v56_v3  }
   0x7   :  { %32 = vperm.xlu0 %734, %v22_v4  }
   0xa   :  { %42 = vperm.xlu1 %735, %v24_v5  }
   0xb   :  { %37 = vperm.xlu0 %734, %v23_v6  }
   0xe   :  { %76 = vperm.xlu1 %735, %v58_v7  }
   0xf   :  { %71 = vperm.xlu0 %734, %v57_v8  }
  0x12   :  { %736 = vset.pattern.permute.xlu1 %v755_v11 }
  0x13   :  { %506 = vperm.xlu0 %734, %v502_v9   ;;  %597 = vperm.xlu1 %736, %v822_v10  }
  0x17   :  { %511 = vperm.xlu0 %734, %v503_v12   ;;  %601 = vperm.xlu1 %736, %v832_v13  }
  0x81   :  { %v62_v15 = vpop.permute.xlu1 %61 }
  0x82   :  { %v28_v16 = vpop.permute.xlu0 %27 }
  0x83   :  { %v51_v17 = vmul.f32 %v665_v14, %v28_v16 }
  0x85   :  { %v838_v18 = vadd.f32 %v62_v15, %v51_v17  ;;  %v67_v19 = vpop.permute.xlu1 %66 }
  0x86   :  { %v33_v20 = vpop.permute.xlu0 %32 }
  0x87   :  { %v86_v21 = vand.u32 2139095040, %v838_v18  ;;  %v52_v22 = vmul.f32 %v665_v14, %v33_v20  ;;  %v83_v39 = vand.u32 2147483647, %v838_v18  ;;  %v759_v20 = vmov 683565275  }
  0x89   :  { %v87_v23 = vshrl.u32 %v86_v21, 23  ;;  %v841_v24 = vadd.f32 %v67_v19, %v52_v22  ;;  %v43_v25 = vpop.permute.xlu1 %42  ;;  %v90_v48 = vand.u32 8388607, %v83_v39 }
  0x8a   :  { %v38_v26 = vpop.permute.xlu0 %37  ;;  %v54_v31 = vmul.f32 %v665_v14, %v43_v25 }
  0x8b   :  { %v666_v27 = vadd.s32 4294967169, %v87_v23  ;;  %v190_v28 = vand.u32 2139095040, %v841_v24  ;;  %v53_v32 = vmul.f32 %v665_v14, %v38_v26  ;;  %v187_v40 = vand.u32 2147483647, %v841_v24 }
  0x8c   :  { %v91_v62 = vor.u32 8388608, %v90_v48 }
  0x8d   :  { %v93_v29 = vadd.s32 1, %v666_v27  ;;  %v191_v30 = vshrl.u32 %v190_v28, 23  ;;  %v77_v33 = vpop.permute.xlu1 %76  ;;  %v194_v49 = vand.u32 8388607, %v187_v40 }
  0x8e   :  { %v72_v34 = vpop.permute.xlu0 %71  ;;  %v844_v36 = vadd.f32 %v77_v33, %v54_v31  ;;  %v881_v8 = vshll.u32 %v91_v62, 8 }
  0x8f   :  { %vm94_vm0 = vcmp.gt.s32.totalorder %v93_v29, 0  ;;  %v670_v35 = vadd.s32 4294967169, %v191_v30  ;;  %v846_v37 = vadd.f32 %v72_v34, %v53_v32  ;;  %v195_v63 = vor.u32 8388608, %v194_v49 }
  0x90   :  { %v95_v38 = vsel %vm94_vm0, %v93_v29, 0  ;;  %v398_v43 = vand.u32 2139095040, %v844_v36  ;;  %v760_v29 = vmov 2475754826  }
  0x91   :  { %v850_v41 = vand.u32 31, %v95_v38  ;;  %v197_v42 = vadd.s32 1, %v670_v35  ;;  %v294_v44 = vand.u32 2139095040, %v846_v37  ;;  %v291_v46 = vand.u32 2147483647, %v846_v37 }
  0x92   :  { %v399_v51 = vshrl.u32 %v398_v43, 23  ;;  %v870_v59 = vshrl.u32 %v95_v38, 5  ;;  %v883_v9 = vshll.u32 %v195_v63, 8 }
  0x93   :  { %v855_v45 = vsub.s32 32, %v850_v41  ;;  %vm198_vm1 = vcmp.gt.s32.totalorder %v197_v42, 0  ;;  %v295_v47 = vshrl.u32 %v294_v44, 23  ;;  %v298_v58 = vand.u32 8388607, %v291_v46 }
  0x94   :  { %v199_v50 = vsel %vm198_vm1, %v197_v42, 0  ;;  %v109_v61 = vshll.u32 %v758_v60, %v850_v41  ;;  %v112_v0 = vshll.u32 %v756_v54, %v850_v41  ;;  %v678_v2 = vadd.s32 4294967169, %v399_v51 }
  0x95   :  { %v862_v52 = vand.u32 31, %v199_v50  ;;  %v674_v53 = vadd.s32 4294967169, %v295_v47  ;;  %v110_v55 = vshrl.u32 %v756_v54, %v855_v45  ;;  %v113_v57 = vshrl.u32 %v757_v56, %v855_v45 }
  0x96   :  { %v299_v6 = vor.u32 8388608, %v298_v58  ;;  %vm118_vm3 = vcmp.lt.s32.totalorder %v870_v59, 4  ;;  %v405_v14 = vadd.s32 1, %v678_v2  ;;  %v888_v16 = vshrl.u32 %v199_v50, 5 }
  0x97   :  { %v877_v1 = vsub.s32 32, %v862_v52  ;;  %v301_v3 = vadd.s32 1, %v674_v53  ;;  %v879_v4 = vor.u32 %v110_v55, %v109_v61  ;;  %v114_v5 = vor.u32 %v113_v57, %v112_v0 }
  0x98   :  { %v213_v17 = vshll.u32 %v758_v60, %v862_v52  ;;  %v894_v19 = vshll.u32 %v756_v54, %v862_v52  ;;  %v898_v21 = vshrl.u32 %v759_v20, %v855_v45  ;;  %v913_v26 = vshll.u32 %v299_v6, 8 }
  0x99   :  { %vm302_vm2 = vcmp.gt.s32.totalorder %v301_v3, 0  ;;  %v214_v12 = vshrl.u32 %v756_v54, %v877_v1  ;;  %v903_v22 = vsel %vm118_vm3, %v879_v4, 920167782  ;;  %v907_v23 = vsel %vm118_vm3, %v114_v5, 1326507024 }
  0x9a   :  { %v303_v7 = vsel %vm302_vm2, %v301_v3, 0  ;;  %v911_v25 = vshrl.u32 %v757_v56, %v877_v1  ;;  %v100_v28 = vshll.u32 %v759_v20, %v850_v41  ;;  %v101_v30 = vshrl.u32 %v760_v29, %v855_v45 }
  0x9b   :  { %v305_v15 = vand.u32 31, %v303_v7  ;;  %v103_v31 = vshll.u32 %v760_v29, %v850_v41  ;;  %v921_v32 = vor.u32 %v214_v12, %v213_v17  ;;  %vm406_vm4 = vcmp.gt.s32.totalorder %v405_v14, 0 }
  0x9c   :  { %v304_v33 = vshrl.u32 %v303_v7, 5  ;;  %v761_v42 = vmov 2131351028   ;;  %v102_v2 = vor.u32 %v101_v30, %v100_v28  ;;  %vm222_vm9 = vcmp.lt.s32.totalorder %v888_v16, 4 }
  0x9d   :  { %v306_v27 = vsub.s32 32, %v305_v15  ;;  %v308_v34 = vshll.u32 %v759_v20, %v305_v15  ;;  %v311_v35 = vshll.u32 %v760_v29, %v305_v15  ;;  %v314_v44 = vshll.u32 %v761_v42, %v305_v15 }
  0x9e   :  { %v317_v48 = vshll.u32 %v758_v60, %v305_v15  ;;  %v320_v50 = vshll.u32 %v756_v54, %v305_v15  ;;  %vm323_vm5 = vcmp.lt.s32.totalorder %v304_v33, 1  ;;  %v104_v63 = vshrl.u32 %v761_v42, %v855_v45 }
  0x9f   :  { %v309_v38 = vshrl.u32 %v760_v29, %v306_v27  ;;  %v312_v43 = vshrl.u32 %v761_v42, %v306_v27  ;;  %v315_v47 = vshrl.u32 %v758_v60, %v306_v27  ;;  %v318_v49 = vshrl.u32 %v756_v54, %v306_v27 }
  0xa0   :  { %v321_v51 = vshrl.u32 %v757_v56, %v306_v27  ;;  %v307_v53 = vshrl.u32 %v759_v20, %v306_v27  ;;  %vm325_vm6 = vcmp.lt.s32.totalorder %v304_v33, 3  ;;  %vm326_vm7 = vcmp.lt.s32.totalorder %v304_v33, 4 }
  0xa1   :  { %v310_v55 = vor.u32 %v309_v38, %v308_v34  ;;  %v313_v57 = vor.u32 %v312_v43, %v311_v35  ;;  %v316_v58 = vor.u32 %v315_v47, %v314_v44  ;;  %v319_v61 = vor.u32 %v318_v49, %v317_v48 }
  0xa2   :  { %v322_v62 = vor.u32 %v321_v51, %v320_v50  ;;  %vm324_vm8 = vcmp.lt.s32.totalorder %v304_v33, 2  ;;  %v105_v38 = vor.u32 %v104_v63, %v103_v31  ;;  %v218_v43 = vor.u32 %v911_v25, %v894_v19 }
  0xa3   :  { %v327_v0 = vsel %vm323_vm5, %v307_v53, %v310_v55  ;;  %v328_v3 = vsel %vm326_vm7, %v316_v58, 2102212464  ;;  %v331_v5 = vsel %vm323_vm5, %v310_v55, %v313_v57  ;;  %v332_v6 = vsel %vm326_vm7, %v319_v61, 920167782 }
  0xa4   :  { %v335_v7 = vsel %vm323_vm5, %v313_v57, %v316_v58  ;;  %v329_v12 = vsel %vm325_vm6, %v313_v57, %v328_v3  ;;  %v333_v15 = vsel %vm325_vm6, %v316_v58, %v332_v6  ;;  %v336_v17 = vsel %vm326_vm7, %v322_v62, 1326507024 }
  0xa5   :  { %v330_v27 = vsel %vm324_vm8, %v327_v0, %v329_v12  ;;  %v334_v34 = vsel %vm324_vm8, %v331_v5, %v333_v15  ;;  %v337_v35 = vsel %vm325_vm6, %v319_v61, %v336_v17  ;;  %v106_v48 = vshll.u32 %v761_v42, %v850_v41 }
  0xa6   :  { %v338_v44 = vsel %vm324_vm8, %v335_v7, %v337_v35  ;;  %v940_v28 = vmul.u32.u64.low %v913_v26, %v334_v34  ;;  %v941_v30 = vmul.u32.u64.high %v913_v26, %v334_v34, %v940_v28  ;;  %v107_v31 = vshrl.u32 %v758_v60, %v855_v45 }
  0xa7   :  { %v945_v33 = vmul.u32.u64.low %v913_v26, %v338_v44  ;;  %v946_v47 = vmul.u32.u64.high %v913_v26, %v338_v44, %v945_v33  ;;  %v953_v19 = vsel %vm406_vm4, %v405_v14, 0  ;;  %v346_v25 = vmul.u32 %v913_v26, %v330_v27 }
  0xa8   :  { %vm115_vm10 = vcmp.lt.s32.totalorder %v870_v59, 1  ;;  %vm116_vm11 = vcmp.lt.s32.totalorder %v870_v59, 2  ;;  %v108_v49 = vor.u32 %v107_v31, %v106_v48  ;;  %vm117_vm12 = vcmp.lt.s32.totalorder %v870_v59, 3 }
  0xa9   :  { %v119_v50 = vsel %vm115_vm10, %v898_v21, %v102_v2  ;;  %v123_v41 = vsel %vm115_vm10, %v102_v2, %v105_v38  ;;  %v349_v45 = vadd.s32 1, %v941_v30  ;;  %v129_v14 = vsel %vm117_vm12, %v879_v4, %v907_v23 }
  0xaa   :  { %v204_v26 = vshll.u32 %v759_v20, %v862_v52  ;;  %v205_v51 = vshrl.u32 %v760_v29, %v877_v1  ;;  %vm348_vm13 = vc.u32 %v946_v47, %v940_v28  ;;  %v120_v21 = vsel %vm118_vm3, %v108_v49, 2102212464 }
  0xab   :  { %v125_v53 = vsel %vm117_vm12, %v108_v49, %v903_v22  ;;  %v208_v55 = vshrl.u32 %v761_v42, %v877_v1  ;;  %v350_v4 = vsel %vm348_vm13, %v349_v45, %v941_v30  ;;  %v127_v57 = vsel %vm115_vm10, %v105_v38, %v108_v49 }
  0xac   :  { %v126_v23 = vsel %vm116_vm11, %v123_v41, %v125_v53  ;;  %v207_v58 = vshll.u32 %v760_v29, %v862_v52  ;;  %v351_v61 = vadd.s32 %v350_v4, %v346_v25  ;;  %v121_v62 = vsel %vm117_vm12, %v105_v38, %v120_v21 }
  0xad   :  { %v130_v22 = vsel %vm116_vm11, %v127_v57, %v129_v14  ;;  %v206_v63 = vor.u32 %v205_v51, %v204_v26  ;;  %v998_v3 = vmul.u32.u64.low %v881_v8, %v126_v23  ;;  %v999_v5 = vmul.u32.u64.high %v881_v8, %v126_v23, %v998_v3 }
  0xae   :  { %v994_v0 = vmul.u32.u64.low %v881_v8, %v130_v22  ;;  %v995_v2 = vmul.u32.u64.high %v881_v8, %v130_v22, %v994_v0  ;;  %v228_v6 = vsel %vm222_vm9, %v921_v32, 920167782  ;;  %v1006_v7 = vand.u32 31, %v953_v19 }
  0xaf   :  { %v352_v12 = vadd.s32 536870912, %v351_v61  ;;  %v209_v15 = vor.u32 %v208_v55, %v207_v58  ;;  %v232_v17 = vsel %vm222_vm9, %v218_v43, 1326507024  ;;  %v122_v27 = vsel %vm116_vm11, %v119_v50, %v121_v62 }
  0xb0   :  { %v210_v34 = vshll.u32 %v761_v42, %v862_v52  ;;  %v211_v35 = vshrl.u32 %v758_v60, %v877_v1  ;;  %v203_v44 = vshrl.u32 %v759_v20, %v877_v1  ;;  %vm219_vm14 = vcmp.lt.s32.totalorder %v888_v16, 1 }
  0xb1   :  { %v1016_v38 = vshrl.u32 %v352_v12, 30  ;;  %vm221_vm15 = vcmp.lt.s32.totalorder %v888_v16, 3  ;;  %vm140_vm0 = vc.u32 %v995_v2, %v998_v3  ;;  %v141_v59 = vadd.s32 1, %v999_v5 }
  0xb2   :  { %v212_v43 = vor.u32 %v211_v35, %v210_v34  ;;  %v227_v52 = vsel %vm219_vm14, %v206_v63, %v209_v15  ;;  %v138_v33 = vmul.u32 %v881_v8, %v122_v27  ;;  %vm220_vm1 = vcmp.lt.s32.totalorder %v888_v16, 2 }
  0xb3   :  { %v354_v30 = vshll.u32 %v1016_v38, 30  ;;  %v233_v1 = vsel %vm221_vm15, %v921_v32, %v232_v17  ;;  %v142_v48 = vsel %vm140_vm0, %v141_v59, %v999_v5  ;;  %v223_v41 = vsel %vm219_vm14, %v203_v44, %v206_v63 }
  0xb4   :  { %v224_v31 = vsel %vm222_vm9, %v212_v43, 2102212464  ;;  %v229_v25 = vsel %vm221_vm15, %v212_v43, %v228_v6  ;;  %v231_v49 = vsel %vm219_vm14, %v209_v15, %v212_v43  ;;  %v143_v8 = vadd.s32 %v142_v48, %v138_v33 }
  0xb5   :  { %v1040_v50 = vsub.s32 %v351_v61, %v354_v30  ;;  %v230_v32 = vsel %vm220_vm1, %v227_v52, %v229_v25  ;;  %v225_v45 = vsel %vm221_vm15, %v209_v15, %v224_v31  ;;  %v234_v14 = vsel %vm220_vm1, %v231_v49, %v233_v1 }
  0xb6   :  { %v1051_v26 = vmul.u32.u64.low %v883_v9, %v230_v32  ;;  %v1052_v51 = vmul.u32.u64.high %v883_v9, %v230_v32, %v1051_v26  ;;  %v144_v53 = vadd.s32 536870912, %v143_v8  ;;  %v1061_v23 = vsub.s32 32, %v1006_v7 }
  0xb7   :  { %v357_v21 = vsub.s32 0, %v1040_v50  ;;  %v1057_v55 = vmul.u32.u64.low %v883_v9, %v234_v14  ;;  %v1058_v4 = vmul.u32.u64.high %v883_v9, %v234_v14, %v1057_v55  ;;  %v226_v61 = vsel %vm220_vm1, %v223_v41, %v225_v45 }
  0xb8   :  { %v1064_v58 = vshrl.u32 %v144_v53, 30  ;;  %v245_v62 = vadd.s32 1, %v1052_v51  ;;  %v422_v63 = vshrl.u32 %v756_v54, %v1061_v23  ;;  %v242_v0 = vmul.u32 %v883_v9, %v226_v61 }
  0xb9   :  { %v675_v57 = vmin.u32 %v357_v21, %v1040_v50  ;;  %vm244_vm2 = vc.u32 %v1058_v4, %v1051_v26  ;;  %v425_v5 = vshrl.u32 %v757_v56, %v1061_v23  ;;  %v421_v15 = vshll.u32 %v758_v60, %v1006_v7 }
  0xba   :  { %v146_v22 = vshll.u32 %v1064_v58, 30  ;;  %v246_v16 = vsel %vm244_vm2, %v245_v62, %v1052_v51  ;;  %v395_v27 = vand.u32 2147483647, %v844_v36  ;;  %v1082_v34 = vshrl.u32 %v953_v19, 5 }
  0xbb   :  { %v359_v6 = vclz %v675_v57  ;;  %v247_v17 = vadd.s32 %v246_v16, %v242_v0  ;;  %v424_v9 = vshll.u32 %v756_v54, %v1006_v7  ;;  %v423_v44 = vor.u32 %v422_v63, %v421_v15 }
  0xbc   :  { %v147_v12 = vsub.s32 %v143_v8, %v146_v22  ;;  %v416_v56 = vshrl.u32 %v761_v42, %v1061_v23  ;;  %v419_v43 = vshrl.u32 %v758_v60, %v1061_v23  ;;  %v413_v1 = vshrl.u32 %v760_v29, %v1061_v23 }
  0xbd   :  { %v248_v59 = vadd.s32 536870912, %v247_v17  ;;  %v426_v52 = vor.u32 %v425_v5, %v424_v9  ;;  %v676_v30 = vadd.s32 4294967294, %v359_v6  ;;  %v402_v54 = vand.u32 8388607, %v395_v27 }
  0xbe   :  { %v149_v35 = vsub.s32 0, %v147_v12  ;;  %v415_v48 = vshll.u32 %v760_v29, %v1006_v7  ;;  %v418_v31 = vshll.u32 %v761_v42, %v1006_v7  ;;  %v412_v60 = vshll.u32 %v759_v20, %v1006_v7 }
  0xbf   :  { %v1092_v19 = vshrl.u32 %v248_v59, 30  ;;  %vm430_vm3 = vcmp.lt.s32.totalorder %v1082_v34, 4  ;;  %vm677_vm4 = vcmp.lt.s32.totalorder %v676_v30, 0  ;;  %v403_v51 = vor.u32 8388608, %v402_v54 }
  0xc0   :  { %v667_v33 = vmin.u32 %v149_v35, %v147_v12  ;;  %v417_v8 = vor.u32 %v416_v56, %v415_v48  ;;  %v420_v41 = vor.u32 %v419_v43, %v418_v31  ;;  %v414_v45 = vor.u32 %v413_v1, %v412_v60 }
  0xc1   :  { %v250_v49 = vshll.u32 %v1092_v19, 30  ;;  %v436_v14 = vsel %vm430_vm3, %v423_v44, 920167782  ;;  %v440_v29 = vsel %vm430_vm3, %v426_v52, 1326507024  ;;  %v139_v7 = vadd.s32 %v998_v3, %v995_v2 }
  0xc2   :  { %v151_v25 = vclz %v667_v33  ;;  %vm427_vm6 = vcmp.lt.s32.totalorder %v1082_v34, 1  ;;  %vm428_vm7 = vcmp.lt.s32.totalorder %v1082_v34, 2  ;;  %v1112_v21 = vsel %vm677_vm4, 0, %v676_v30 }
  0xc3   :  { %v251_v42 = vsub.s32 %v247_v17, %v250_v49  ;;  %v439_v57 = vsel %vm427_vm6, %v417_v8, %v420_v41  ;;  %vm429_vm8 = vcmp.lt.s32.totalorder %v1082_v34, 3  ;;  %v435_v22 = vsel %vm427_vm6, %v414_v45, %v417_v8 }
  0xc4   :  { %v668_v32 = vadd.s32 4294967294, %v151_v25  ;;  %v437_v3 = vsel %vm429_vm8, %v420_v41, %v436_v14  ;;  %v441_v63 = vsel %vm429_vm8, %v423_v44, %v440_v29  ;;  %v443_v0 = vshll.u32 %v403_v51, 8 }
  0xc5   :  { %v253_v55 = vsub.s32 0, %v251_v42  ;;  %v442_v15 = vsel %vm428_vm7, %v439_v57, %v441_v63  ;;  %v432_v9 = vsel %vm430_vm3, %v420_v41, 2102212464  ;;  %v411_v52 = vshrl.u32 %v759_v20, %v1061_v23 }
  0xc6   :  { %vm669_vm5 = vcmp.lt.s32.totalorder %v668_v32, 0  ;;  %v1127_v35 = vmul.u32.u64.low %v443_v0, %v442_v15  ;;  %v1128_v59 = vmul.u32.u64.high %v443_v0, %v442_v15, %v1127_v35  ;;  %v367_v30 = vsub.s32 4294967266, %v1112_v21 }
  0xc7   :  { %v154_v53 = vsel %vm669_vm5, 0, %v668_v32  ;;  %v671_v2 = vmin.u32 %v253_v55, %v251_v42  ;;  %v431_v1 = vsel %vm427_vm6, %v411_v52, %v414_v45  ;;  %v433_v54 = vsel %vm429_vm8, %v417_v8, %v432_v9 }
  0xc8   :  { %v155_v61 = vsub.s32 32, %v154_v53  ;;  %v159_v62 = vsub.s32 4294967266, %v154_v53  ;;  %v156_v5 = vshll.u32 %v147_v12, %v154_v53  ;;  %v438_v12 = vsel %vm428_vm7, %v435_v22, %v437_v3 }
  0xc9   :  { %v255_v17 = vclz %v671_v2  ;;  %v1139_v48 = vmul.u32.u64.low %v443_v0, %v438_v12  ;;  %v1140_v31 = vmul.u32.u64.high %v443_v0, %v438_v12, %v1139_v48  ;;  %v243_v60 = vadd.s32 %v1051_v26, %v1058_v4 }
  0xca   :  { %v157_v6 = vshrl.u32 %v139_v7, %v155_v61  ;;  %v160_v16 = vadd.s32 127, %v159_v62  ;;  %v434_v32 = vsel %vm428_vm7, %v431_v1, %v433_v54  ;;  %v368_v45 = vadd.s32 127, %v367_v30 }
  0xcb   :  { %v672_v44 = vadd.s32 4294967294, %v255_v17  ;;  %vm85_vm10 = vcmp.lt.s32.totalorder %v838_v18, 0  ;;  %vm452_vm11 = vc.u32 %v1128_v59, %v1139_v48  ;;  %v453_v7 = vadd.s32 1, %v1140_v31 }
  0xcc   :  { %v158_v56 = vor.u32 %v157_v6, %v156_v5  ;;  %v161_v43 = vshll.u32 %v160_v16, 23  ;;  %v363_v53 = vsub.s32 32, %v1112_v21  ;;  %v450_v4 = vmul.u32 %v443_v0, %v434_v32 }
  0xcd   :  { %vm673_vm9 = vcmp.lt.s32.totalorder %v672_v44, 0  ;;  %vm514_vm12 = vcmask 261120   ;;  %vm1154_vm13 = vcmp.le.f32.partialorder %v83_v39, 0.7853982  ;;  %v454_v61 = vsel %vm452_vm11, %v453_v7, %v1140_v31 }
  0xce   :  { %v162_v33 = vor.u32 4788187, %v161_v43  ;;  %v165_v20 = vcvt.s32.f32 %v158_v56  ;;  %v258_v23 = vsel %vm673_vm9, 0, %v672_v44  ;;  %698 = vmatprep.mubr.msk.f32.mxu0 %vm514_vm12, %v822_v10  ;;  %v369_v62 = vshll.u32 %v368_v45, 23 }
  0xcf   :  { %v259_v49 = vsub.s32 32, %v258_v23  ;;  %v263_v41 = vsub.s32 4294967266, %v258_v23  ;;  %v260_v14 = vshll.u32 %v251_v42, %v258_v23  ;;  %v347_v42 = vadd.s32 %v940_v28, %v946_v47 }
  0xd0   :  { %v163_v25 = vand.u32 2147483647, %v162_v33  ;;  %v455_v2 = vadd.s32 %v454_v61, %v450_v4  ;;  %v169_v39 = vsub.s32 4, %v1064_v58  ;;  %v364_v28 = vshll.u32 %v1040_v50, %v1112_v21 }
  0xd1   :  { %v261_v29 = vshrl.u32 %v243_v60, %v259_v49  ;;  %v264_v51 = vadd.s32 127, %v263_v41  ;;  %v365_v0 = vshrl.u32 %v347_v42, %v363_v53  ;;  %v370_v47 = vor.u32 4788187, %v369_v62 }
  0xd2   :  { %v166_v8 = vmul.f32 %v165_v20, %v163_v25  ;;  %v456_v5 = vadd.s32 536870912, %v455_v2  ;;  %v170_v15 = vsel %vm85_vm10, %v169_v39, %v1064_v58  ;;  %v273_v9 = vsub.s32 4, %v1092_v19 }
  0xd3   :  { %v262_v55 = vor.u32 %v261_v29, %v260_v14  ;;  %v265_v57 = vshll.u32 %v264_v51, 23  ;;  %v366_v35 = vor.u32 %v365_v0, %v364_v28  ;;  %v371_v52 = vand.u32 2147483647, %v370_v47 }
  0xd4   :  { %v167_v26 = vxor.u32 2147483648, %v166_v8  ;;  %v1171_v16 = vshrl.u32 %v456_v5, 30  ;;  %v172_v12 = vsel %vm1154_vm13, 0, %v170_v15  ;;  %vm189_vm14 = vcmp.lt.s32.totalorder %v841_v24, 0 }
  0xd5   :  { %v266_v63 = vor.u32 4788187, %v265_v57  ;;  %v269_v10 = vcvt.s32.f32 %v262_v55  ;;  %vm1183_vm15 = vcmp.le.f32.partialorder %v187_v40, 0.7853982  ;;  %v274_v44 = vsel %vm189_vm14, %v273_v9, %v1092_v19 }
  0xd6   :  { %v168_v22 = vsel %vm85_vm10, %v167_v26, %v166_v8  ;;  %v458_v56 = vshll.u32 %v1171_v16, 30  ;;  %v373_v30 = vcvt.s32.f32 %v366_v35  ;;  %v176_v54 = vadd.s32 3, %v172_v12 }
  0xd7   :  { %v171_v3 = vsel %vm1154_vm13, %v838_v18, %v168_v22  ;;  %v267_v6 = vand.u32 2147483647, %v266_v63  ;;  %v276_v25 = vsel %vm1183_vm15, 0, %v274_v44  ;;  %vm293_vm0 = vcmp.lt.s32.totalorder %v846_v37, 0 }
  0xd8   :  { %738 = vcosq.f32 %v171_v3  ;;  %v459_v50 = vsub.s32 %v455_v2, %v458_v56  ;;  %v374_v31 = vmul.f32 %v373_v30, %v371_v52  ;;  %v177_v49 = vand.u32 3, %v176_v54 }
  0xd9   :  { %740 = vsinq.f32 %v171_v3  ;;  %v270_v17 = vmul.f32 %v269_v10, %v267_v6  ;;  %v280_v41 = vadd.s32 3, %v276_v25  ;;  %v451_v7 = vadd.s32 %v1139_v48, %v1128_v59 }
  0xda   :  { %v461_v1 = vsub.s32 0, %v459_v50  ;;  %v375_v19 = vxor.u32 2147483648, %v374_v31  ;;  %vm179_vm2 = vcmp.eq.s32.totalorder %v177_v49, 0  ;;  %vm182_vm3 = vcmp.eq.s32.totalorder %v177_v49, 2 }
  0xdb   :  { %v271_v43 = vxor.u32 2147483648, %v270_v17  ;;  %v281_v14 = vand.u32 3, %v280_v41  ;;  %vm1200_vm4 = vcmp.le.f32.partialorder %v291_v46, 0.7853982  ;;  %vm178_vm5 = vcmp.lt.s32.totalorder %v177_v49, 2 }
  0xdc   :  { %v679_v40 = vmin.u32 %v461_v1, %v459_v50  ;;  %v376_v51 = vsel %vm293_vm0, %v375_v19, %v374_v31  ;;  %vm175_vm8 = vweird.f32 %v838_v18  ;;  %v377_v5 = vsub.s32 4, %v1016_v38 }
  0xdd   :  { %v272_v58 = vsel %vm189_vm14, %v271_v43, %v270_v17  ;;  %v379_v59 = vsel %vm1200_vm4, %v846_v37, %v376_v51  ;;  %vm283_vm6 = vcmp.eq.s32.totalorder %v281_v14, 0  ;;  %vm286_vm7 = vcmp.eq.s32.totalorder %v281_v14, 2  ;;  %v598_v51 = vpop.permute.xlu1 %597 }
  0xde   :  { %v275_v33 = vsel %vm1183_vm15, %v841_v24, %v272_v58  ;;  %v463_v60 = vclz %v679_v40  ;;  %vm282_vm9 = vcmp.lt.s32.totalorder %v281_v14, 2  ;;  %vm279_vm10 = vweird.f32 %v841_v24 }
  0xdf   :  { %742 = vcosq.f32 %v275_v33  ;;  %v378_v35 = vsel %vm293_vm0, %v377_v5, %v1016_v38  ;;  %v481_v56 = vsub.s32 4, %v1171_v16  ;;  %vm397_vm11 = vcmp.lt.s32.totalorder %v844_v36, 0 }
  0xe0   :  { %744 = vsinq.f32 %v275_v33  ;;  %v680_v32 = vadd.s32 4294967294, %v463_v60  ;;  %v380_v24 = vsel %vm1200_vm4, 0, %v378_v35  ;;  %vm396_vm13 = vcmp.le.f32.partialorder %v395_v27, 0.7853982 }
  0xe1   :  { %746 = vcosq.f32 %v379_v59  ;;  %v482_v12 = vsel %vm397_vm11, %v481_v56, %v1171_v16  ;;  %v384_v38 = vadd.s32 3, %v380_v24  ;;  %v604_v14 = vlaneseq }
  0xe2   :  { %v739_v20 = vpop.eup %738  ;;  %vm681_vm1 = vcmp.lt.s32.totalorder %v680_v32, 0  ;;  %748 = vsinq.f32 %v379_v59  ;;  %v484_v44 = vsel %vm396_vm13, 0, %v482_v12 }
  0xe3   :  { %v741_v23 = vpop.eup %740  ;;  %v183_v8 = vxor.u32 2147483648, %v739_v20  ;;  %v466_v29 = vsel %vm681_vm1, 0, %v680_v32  ;;  %v385_v30 = vand.u32 3, %v384_v38  ;;  %v488_v33 = vadd.s32 3, %v484_v44 }
  0xe4   :  { %v180_v45 = vxor.u32 2147483648, %v741_v23  ;;  %v467_v53 = vsub.s32 32, %v466_v29  ;;  %v471_v26 = vsub.s32 4294967266, %v466_v29  ;;  %v468_v62 = vshll.u32 %v459_v50, %v466_v29 }
  0xe5   :  { %v184_v57 = vsel %vm182_vm3, %v183_v8, %v741_v23  ;;  %vm387_vm14 = vcmp.eq.s32.totalorder %v385_v30, 0  ;;  %vm390_vm15 = vcmp.eq.s32.totalorder %v385_v30, 2  ;;  %v489_v31 = vand.u32 3, %v488_v33 }
  0xe6   :  { %v181_v55 = vsel %vm179_vm2, %v739_v20, %v180_v45  ;;  %v469_v22 = vshrl.u32 %v451_v7, %v467_v53  ;;  %v472_v2 = vadd.s32 127, %v471_v26  ;;  %vm386_vm0 = vcmp.lt.s32.totalorder %v385_v30, 2 }
  0xe7   :  { %v185_v39 = vsel %vm178_vm5, %v181_v55, %v184_v57  ;;  %vm494_vm1 = vcmp.eq.s32.totalorder %v489_v31, 2  ;;  %vm491_vm2 = vcmp.eq.s32.totalorder %v489_v31, 0  ;;  %vm383_vm3 = vweird.f32 %v846_v37  ;;  %v507_v37 = vpop.permute.xlu0 %506 }
  0xe8   :  { %v470_v3 = vor.u32 %v469_v22, %v468_v62  ;;  %v473_v63 = vshll.u32 %v472_v2, 23  ;;  %v186_v28 = vsel %vm175_vm8, nan, %v185_v39  ;;  %vm490_vm4 = vcmp.lt.s32.totalorder %v489_v31, 2 }
  0xe9   :  { %v743_v4 = vpop.eup %742  ;;  %vm487_vm5 = vweird.f32 %v844_v36  ;;  %v605_v29 = vshrl.u32 %v604_v14, 7 }
  0xea   :  { %v745_v61 = vpop.eup %744  ;;  %v287_v42 = vxor.u32 2147483648, %v743_v4  ;;  %v474_v10 = vor.u32 4788187, %v473_v63  ;;  %v477_v9 = vcvt.s32.f32 %v470_v3 }
  0xeb   :  { %v284_v48 = vxor.u32 2147483648, %v745_v61  ;;  %v747_v21 = vpop.eup %746  ;;  %v606_v7 = vsub.s32 7, %v605_v29  ;;  %v512_v34 = vpop.permute.xlu0 %511 }
  0xec   :  { %v288_v46 = vsel %vm286_vm7, %v287_v42, %v745_v61  ;;  %v475_v17 = vand.u32 2147483647, %v474_v10  ;;  %v749_v58 = vpop.eup %748  ;;  %v391_v54 = vxor.u32 2147483648, %v747_v21 }
  0xed   :  { %v285_v0 = vsel %vm283_vm6, %v743_v4, %v284_v48  ;;  %v388_v1 = vxor.u32 2147483648, %v749_v58  ;;  %v602_v4 = vpop.permute.xlu1 %601 }
  0xee   :  { %v289_v6 = vsel %vm282_vm9, %v285_v0, %v288_v46  ;;  %v478_v18 = vmul.f32 %v477_v9, %v475_v17  ;;  %v392_v27 = vsel %vm390_vm15, %v391_v54, %v749_v58 }
  0xef   :  { %v290_v47 = vsel %vm279_vm10, nan, %v289_v6  ;;  %v389_v25 = vsel %vm387_vm14, %v747_v21, %v388_v1 }
  0xf0   :  { %v701_v15 = vpack.c.bf16 %v290_v47, %v186_v28  ;;  %v479_v43 = vxor.u32 2147483648, %v478_v18  ;;  %v393_v23 = vsel %vm386_vm0, %v389_v25, %v392_v27 }
  0xf1   :  { %v394_v19 = vsel %vm383_vm3, nan, %v393_v23 }
  0xf2   :  { %702 = vmatprep.subr.bf16.mxu0 %v701_v15  ;;  %v480_v52 = vsel %vm397_vm11, %v479_v43, %v478_v18 }
  0xf3   :  { %704 = vmatpush3.bf16.msra.mxu0 %v701_v15  ;;  %v483_v50 = vsel %vm396_vm13, %v844_v36, %v480_v52 }
  0xf4   :  { %750 = vcosq.f32 %v483_v50 }
  0xf5   :  { %752 = vsinq.f32 %v483_v50 }
  0xfe   :  { %v751_v40 = vpop.eup %750 }
  0xff   :  { %v753_v16 = vpop.eup %752  ;;  %v495_v20 = vxor.u32 2147483648, %v751_v40 }
 0x100   :  { %v492_v60 = vxor.u32 2147483648, %v753_v16 }
 0x101   :  { %v496_v49 = vsel %vm494_vm1, %v495_v20, %v753_v16 }
 0x102   :  { %v493_v41 = vsel %vm491_vm2, %v751_v40, %v492_v60 }
 0x103   :  { %v497_v32 = vsel %vm490_vm4, %v493_v41, %v496_v49 }
 0x104   :  { %v498_v45 = vsel %vm487_vm5, nan, %v497_v32 }
 0x105   :  { %v705_v8 = vpack.c.bf16 %v498_v45, %v394_v19  ;;  %v501_v53 = vsub.f32 %v844_v36, %v498_v45 }
 0x107   :  { %706 = vmatprep.subr.bf16.mxu0 %v705_v8  ;;  %v607_v26 = vrot.slane %v501_v53, %v606_v7 }
 0x108   :  { %708 = vmatpush3.bf16.msra.mxu0 %v705_v8 }
 0x109   :  { %v609_v57 = vmul.f32 %v607_v26, %v602_v4  ;;  %v608_v62 = vmul.f32 %v607_v26, %v598_v51 }
 0x10b   :  { %699 = vmatmul.mubr.msk.f32.vlgmr.msra.gmra.mrb[0].mxu0 %vm514_vm12, %v832_v13  ;;  %vm644_vm12 = vcmask 130048  }
 0x1de   :  { %v700_v55 = vpop.f32.mrb[0].mxu0 }
 0x1df   :  { %v593_v61 = vadd.f32 %v700_v55, %v512_v34  ;;  %v587_v42 = vpop.f32.mrb[1].mxu0 }
 0x1e0   :  { %v588_v22 = vadd.f32 %v587_v42, %v507_v37 }
 0x1e1   :  { %v611_v2 = vadd.f32 %v609_v57, %v593_v61 }
 0x1e2   :  { %v610_v59 = vadd.f32 %v608_v62, %v588_v22 }
 0x1e4   :  { %612 = vxpose.xlu0.b32.start [1/2] (short) %v610_v59, 128 }
 0x1e8   :  { %613 = vxpose.xlu0.b32.end [2/2] (short) %v611_v2, 128 }
 0x211   :  { %737 = vset.pattern.permute.xlu0 %v755_v11 }
 0x264   :  { %v628_v13 = vpop.trf.xlu0 }
 0x265   :  { %645 = vst.msk [vmem:[%s1296_s5] sm:$0xff] %vm644_vm12, %v628_v13 }
 0x268   :  { %v629_v36 = vpop.trf.xlu0 }
 0x269   :  { %646 = vst.msk [vmem:[%s1296_s5 + $0x8] sm:$0xff] %vm644_vm12, %v629_v36 }
 0x26c   :  { %v630_v48 = vpop.trf.xlu0 }
 0x26d   :  { %647 = vst.msk [vmem:[%s1296_s5 + $0x10] sm:$0xff] %vm644_vm12, %v630_v48 }
 0x270   :  { %v631_v11 = vpop.trf.xlu0 }
 0x271   :  { %648 = vst.msk [vmem:[%s1296_s5 + $0x18] sm:$0xff] %vm644_vm12, %v631_v11 }
 0x274   :  { %v632_v39 = vpop.trf.xlu0 }
 0x275   :  { %649 = vst.msk [vmem:[%s1296_s5 + $0x20] sm:$0xff] %vm644_vm12, %v632_v39 }
 0x278   :  { %v633_v46 = vpop.trf.xlu0 }
 0x279   :  { %650 = vst.msk [vmem:[%s1296_s5 + $0x28] sm:$0xff] %vm644_vm12, %v633_v46 }
 0x27c   :  { %v634_v3 = vpop.trf.xlu0 }
 0x27d   :  { %651 = vst.msk [vmem:[%s1296_s5 + $0x30] sm:$0xff] %vm644_vm12, %v634_v3 }
 0x280   :  { %v635_v63 = vpop.trf.xlu0 }
 0x281   :  { %652 = vst.msk [vmem:[%s1296_s5 + $0x38] sm:$0xff] %vm644_vm12, %v635_v63 }
 0x284   :  { %v636_v0 = vpop.trf.xlu0 }
 0x285   :  { %653 = vst.msk [vmem:[%s1296_s5 + $0x40] sm:$0xff] %vm644_vm12, %v636_v0 }
 0x288   :  { %v637_v5 = vpop.trf.xlu0 }
 0x289   :  { %654 = vst.msk [vmem:[%s1296_s5 + $0x48] sm:$0xff] %vm644_vm12, %v637_v5 }
 0x28c   :  { %v638_v6 = vpop.trf.xlu0 }
 0x28d   :  { %655 = vst.msk [vmem:[%s1296_s5 + $0x50] sm:$0xff] %vm644_vm12, %v638_v6 }
 0x290   :  { %v639_v10 = vpop.trf.xlu0 }
 0x291   :  { %656 = vst.msk [vmem:[%s1296_s5 + $0x58] sm:$0xff] %vm644_vm12, %v639_v10 }
 0x294   :  { %v640_v28 = vpop.trf.xlu0 }
 0x295   :  { %657 = vst.msk [vmem:[%s1296_s5 + $0x60] sm:$0xff] %vm644_vm12, %v640_v28 }
 0x298   :  { %v641_v47 = vpop.trf.xlu0 }
 0x299   :  { %658 = vst.msk [vmem:[%s1296_s5 + $0x68] sm:$0xff] %vm644_vm12, %v641_v47 }
 0x29c   :  { %v642_v15 = vpop.trf.xlu0 }
 0x29d   :  { %659 = vst.msk [vmem:[%s1296_s5 + $0x70] sm:$0xff] %vm644_vm12, %v642_v15 }
 0x2a0   :  { %v643_v17 = vpop.trf.xlu0 }
 0x2a1   :  { %660 = vst.msk [vmem:[%s1296_s5 + $0x78] sm:$0xff] %vm644_vm12, %v643_v17 }

</bundles_post_ra>
